<compile_context>
chip_gen: v5e
topology: v5e:2x2
jax: 0.10.0
libtpu: 0.0.40
codegen_flags: <defaults>
</compile_context>

<pallas_src>
import jax
import jax.numpy as jnp
from jax.experimental import pallas as pl
from jax.experimental.pallas import tpu as pltpu


# ---------------------------------------------------------------------------
# Pallas kernel: fused fc1 + ReLU + fc2 for one batch tile
# ---------------------------------------------------------------------------

def _two_layer_fc_kernel(x_ref, w1_ref, b1_ref, w2_ref, b2_ref, o_ref):
    # x_ref : (TM, D)   flattened input tile (f32 or bf16)
    # w1_ref: (D, H)    fc1 weight, pre-transposed (same dtype as x)
    # b1_ref: (1, H)    f32
    # w2_ref: (H, Cp)   fc2 weight, pre-transposed + class-padded, f32
    # b2_ref: (1, Cp)   f32
    # o_ref : (TM, Cp)  f32, lane-dense (Cp multiple of 128)
    h = jnp.dot(x_ref[...], w1_ref[...], preferred_element_type=jnp.float32)
    h = jnp.maximum(h + b1_ref[...], 0.0)                      # f32 epilogue (v5e-safe)
    s = jnp.dot(h, w2_ref[...], preferred_element_type=jnp.float32)
    o_ref[...] = (s + b2_ref[...]).astype(o_ref.dtype)


# ---------------------------------------------------------------------------
# Wrapper
# ---------------------------------------------------------------------------

def _round_up(a, b):
    return (a + b - 1) // b * b


def two_layer_fc(x, w1, b1, w2, b2, *, block_m=512, compute_dtype=jnp.bfloat16):
    """TwoLayerFC forward: flatten -> fc1 -> relu -> fc2.

    x : (N, ...) any trailing dims (row-major flatten, like torch .view(N,-1)).
    w1: (H, D), b1: (H,)   fc1 params in PyTorch layout.
    w2: (C, H), b2: (C,)   fc2 params in PyTorch layout.
    compute_dtype: dtype for the HBM-streamed operands (x, w1) and the first
        MXU matmul inputs; accumulation and the epilogue stay float32.
    returns (N, C) float32 scores.
    """
    n = x.shape[0]
    x_flat = x.reshape(n, -1)
    d = x_flat.shape[1]
    h = w1.shape[0]
    c = w2.shape[0]

    # Lane-dense output: pad class dim to a multiple of 128 (unmasked stores).
    c_pad = _round_up(c, 128)

    # Fixed batch tile + cdiv grid with zero-padded batch (no full-batch fallback).
    tm = min(block_m, _round_up(n, 8))
    n_pad = _round_up(n, tm)
    grid_m = n_pad // tm
    if n_pad != n:
        x_flat = jnp.pad(x_flat, ((0, n_pad - n), (0, 0)))

    # Pre-transpose the grid-invariant weights once (standard MXU orientation,
    # no per-step in-kernel transpose); pad fc2 rows for the lane-dense output.
    x_in = x_flat.astype(compute_dtype)
    w1t = w1.T.astype(compute_dtype)                               # (D, H)
    w2t = jnp.pad(w2, ((0, c_pad - c), (0, 0))).T                  # (H, Cp), f32
    b1r = b1.reshape(1, h).astype(jnp.float32)
    b2p = jnp.pad(b2, (0, c_pad - c)).reshape(1, c_pad).astype(jnp.float32)

    itemsize = jnp.dtype(compute_dtype).itemsize
    flops = 2 * n_pad * (d * h + h * c_pad)
    bytes_accessed = (n_pad * d * itemsize + d * h * itemsize
                      + h * c_pad * 4 + h * 4 + c_pad * 4
                      + n_pad * c_pad * 4)

    out = pl.pallas_call(
        _two_layer_fc_kernel,
        out_shape=jax.ShapeDtypeStruct((n_pad, c_pad), jnp.float32),
        grid=(grid_m,),
        in_specs=[
            pl.BlockSpec((tm, d), lambda i: (i, 0)),     # x tile (pipelined)
            pl.BlockSpec((d, h), lambda i: (0, 0)),      # fc1 weight (resident)
            pl.BlockSpec((1, h), lambda i: (0, 0)),      # fc1 bias
            pl.BlockSpec((h, c_pad), lambda i: (0, 0)),  # fc2 weight (resident)
            pl.BlockSpec((1, c_pad), lambda i: (0, 0)),  # fc2 bias
        ],
        out_specs=pl.BlockSpec((tm, c_pad), lambda i: (i, 0)),
        compiler_params=pltpu.CompilerParams(
            dimension_semantics=("parallel",)),
        cost_estimate=pl.CostEstimate(flops=flops, transcendentals=0,
                                      bytes_accessed=bytes_accessed),
    )(x_in, w1t, b1r, w2t, b2p)

    return out[:n, :c]


# ---------------------------------------------------------------------------
# Params / reference
# ---------------------------------------------------------------------------

def init_params(key, input_size, hidden_size, num_classes):
    k1, k2, k3, k4 = jax.random.split(key, 4)
    # kaiming_normal_ (fan_in, gain sqrt(2)) weights; PyTorch-default uniform biases.
    w1 = jax.random.normal(k1, (hidden_size, input_size), jnp.float32) * jnp.sqrt(2.0 / input_size)
    b1 = jax.random.uniform(k2, (hidden_size,), jnp.float32,
                            -1.0 / jnp.sqrt(input_size), 1.0 / jnp.sqrt(input_size))
    w2 = jax.random.normal(k3, (num_classes, hidden_size), jnp.float32) * jnp.sqrt(2.0 / hidden_size)
    b2 = jax.random.uniform(k4, (num_classes,), jnp.float32,
                            -1.0 / jnp.sqrt(hidden_size), 1.0 / jnp.sqrt(hidden_size))
    return dict(w1=w1, b1=b1, w2=w2, b2=b2)


def reference(x, p, compute_dtype=jnp.float32):
    """Plain-JAX reference (flatten -> fc1 -> relu -> fc2), matching input rounding."""
    xf = x.reshape(x.shape[0], -1).astype(compute_dtype)
    w1 = p["w1"].astype(compute_dtype)
    hid = jnp.maximum(
        jnp.dot(xf, w1.T, preferred_element_type=jnp.float32) + p["b1"], 0.0)
    return jnp.dot(hid, p["w2"].T, preferred_element_type=jnp.float32) + p["b2"]


# ---------------------------------------------------------------------------
# Main
# ---------------------------------------------------------------------------

if __name__ == "__main__":
    BATCH, CHANNELS, SPATIAL = 2, 4, 16
    INPUT_SIZE = CHANNELS * SPATIAL * SPATIAL      # 1024
    HIDDEN = 32
    NUM_CLASSES = 10

    key = jax.random.PRNGKey(0)
    pkey, xkey = jax.random.split(key)
    params = init_params(pkey, INPUT_SIZE, HIDDEN, NUM_CLASSES)
    x = jax.random.normal(xkey, (BATCH, CHANNELS, SPATIAL, SPATIAL), jnp.float32)

    # f32 path: exact check against the plain-JAX reference.
    fwd_f32 = jax.jit(lambda x, p: two_layer_fc(
        x, p["w1"], p["b1"], p["w2"], p["b2"], compute_dtype=jnp.float32))
    scores = jax.block_until_ready(fwd_f32(x, params))
    assert scores.shape == (BATCH, NUM_CLASSES)
    ref_f32 = jax.block_until_ready(reference(x, params, jnp.float32))
    err = jnp.max(jnp.abs(scores - ref_f32))
    assert jnp.allclose(scores, ref_f32, rtol=1e-4, atol=1e-4), f"f32 mismatch: {err}"

    # bf16 streaming path (v6e/v7x bandwidth lever): check against a reference
    # that uses identically-rounded bf16 inputs with f32 accumulation.
    fwd_bf16 = jax.jit(lambda x, p: two_layer_fc(
        x, p["w1"], p["b1"], p["w2"], p["b2"], compute_dtype=jnp.bfloat16))
    scores_bf16 = jax.block_until_ready(fwd_bf16(x, params))
    ref_bf16 = jax.block_until_ready(reference(x, params, jnp.bfloat16))
    err_bf16 = jnp.max(jnp.abs(scores_bf16 - ref_bf16))
    assert jnp.allclose(scores_bf16, ref_bf16, rtol=1e-3, atol=1e-3), \
        f"bf16 mismatch: {err_bf16}"

    print("KERNEL_OK")
</pallas_src>

<mosaic_0001>
module attributes {stable_mosaic.version = 11 : i64} {
  func.func @_two_layer_fc_kernel(%arg0: i32, %arg1: memref<8x1024xf32, #tpu.memory_space<vmem>>, %arg2: memref<1024x32xf32, #tpu.memory_space<vmem>>, %arg3: memref<1x32xf32, #tpu.memory_space<vmem>>, %arg4: memref<32x128xf32, #tpu.memory_space<vmem>>, %arg5: memref<1x128xf32, #tpu.memory_space<vmem>>, %arg6: memref<8x128xf32, #tpu.memory_space<vmem>>) attributes {dimension_semantics = [#tpu.dimension_semantics<parallel>], iteration_bounds = array<i64: 1>, scalar_prefetch = 0 : i64, scratch_operands = 0 : i64, tpu.core_type = #tpu.core_type<tc>, window_params = [{transform_indices = @transform_0, window_bounds = array<i64: 8, 1024>}, {pipeline_mode = #tpu.pipeline_mode<synchronous>, transform_indices = @transform_1, window_bounds = array<i64: 1024, 32>}, {pipeline_mode = #tpu.pipeline_mode<synchronous>, transform_indices = @transform_2, window_bounds = array<i64: 1, 32>}, {pipeline_mode = #tpu.pipeline_mode<synchronous>, transform_indices = @transform_3, window_bounds = array<i64: 32, 128>}, {pipeline_mode = #tpu.pipeline_mode<synchronous>, transform_indices = @transform_4, window_bounds = array<i64: 1, 128>}, {transform_indices = @transform_5, window_bounds = array<i64: 8, 128>}]} {
    %c0 = arith.constant 0 : index
    %c0_0 = arith.constant 0 : index
    %0 = vector.load %arg1[%c0, %c0_0] : memref<8x1024xf32, #tpu.memory_space<vmem>>, vector<8x1024xf32>
    %c0_1 = arith.constant 0 : index
    %c0_2 = arith.constant 0 : index
    %1 = vector.load %arg2[%c0_1, %c0_2] : memref<1024x32xf32, #tpu.memory_space<vmem>>, vector<1024x32xf32>
    %cst = arith.constant dense<0.000000e+00> : vector<8x32xf32>
    %2 = tpu.matmul %0, %1, %cst {dimension_numbers = #tpu.dot_dimension_numbers<[1], [0], [0], [1], [0, 0, 1, 1], [], []>} : vector<8x1024xf32>, vector<1024x32xf32>, vector<8x32xf32> -> vector<8x32xf32>
    %c0_3 = arith.constant 0 : index
    %c0_4 = arith.constant 0 : index
    %3 = vector.load %arg3[%c0_3, %c0_4] : memref<1x32xf32, #tpu.memory_space<vmem>>, vector<1x32xf32>
    %4 = vector.broadcast %3 : vector<1x32xf32> to vector<8x32xf32>
    %5 = arith.addf %2, %4 : vector<8x32xf32>
    %cst_5 = arith.constant 0.000000e+00 : f32
    %6 = vector.broadcast %cst_5 : f32 to vector<8x32xf32>
    %7 = arith.maximumf %5, %6 : vector<8x32xf32>
    %c0_6 = arith.constant 0 : index
    %c0_7 = arith.constant 0 : index
    %8 = vector.load %arg4[%c0_6, %c0_7] : memref<32x128xf32, #tpu.memory_space<vmem>>, vector<32x128xf32>
    %cst_8 = arith.constant dense<0.000000e+00> : vector<8x128xf32>
    %9 = tpu.matmul %7, %8, %cst_8 {dimension_numbers = #tpu.dot_dimension_numbers<[1], [0], [0], [1], [0, 0, 1, 1], [], []>} : vector<8x32xf32>, vector<32x128xf32>, vector<8x128xf32> -> vector<8x128xf32>
    %c0_9 = arith.constant 0 : index
    %c0_10 = arith.constant 0 : index
    %10 = vector.load %arg5[%c0_9, %c0_10] : memref<1x128xf32, #tpu.memory_space<vmem>>, vector<1x128xf32>
    %11 = vector.broadcast %10 : vector<1x128xf32> to vector<8x128xf32>
    %12 = arith.addf %9, %11 : vector<8x128xf32>
    %c0_11 = arith.constant 0 : index
    %c0_12 = arith.constant 0 : index
    %13 = vector.load %arg6[%c0_11, %c0_12] : memref<8x128xf32, #tpu.memory_space<vmem>>, vector<8x128xf32>
    tpu.vector_store %arg6[%c0_11, %c0_12], %12 {strides = array<i32>} : memref<8x128xf32, #tpu.memory_space<vmem>>, vector<8x128xf32>,
    return
  }
  func.func @transform_0(%arg0: i32) -> (i32, i32) {
    %c0_i32 = arith.constant 0 : i32
    %c0_i32_0 = arith.constant 0 : i32
    return %arg0, %c0_i32 : i32, i32
  }
  func.func @transform_1(%arg0: i32) -> (i32, i32) {
    %c0_i32 = arith.constant 0 : i32
    %c0_i32_0 = arith.constant 0 : i32
    %c0_i32_1 = arith.constant 0 : i32
    return %c0_i32, %c0_i32_0 : i32, i32
  }
  func.func @transform_2(%arg0: i32) -> (i32, i32) {
    %c0_i32 = arith.constant 0 : i32
    %c0_i32_0 = arith.constant 0 : i32
    %c0_i32_1 = arith.constant 0 : i32
    return %c0_i32, %c0_i32_0 : i32, i32
  }
  func.func @transform_3(%arg0: i32) -> (i32, i32) {
    %c0_i32 = arith.constant 0 : i32
    %c0_i32_0 = arith.constant 0 : i32
    %c0_i32_1 = arith.constant 0 : i32
    return %c0_i32, %c0_i32_0 : i32, i32
  }
  func.func @transform_4(%arg0: i32) -> (i32, i32) {
    %c0_i32 = arith.constant 0 : i32
    %c0_i32_0 = arith.constant 0 : i32
    %c0_i32_1 = arith.constant 0 : i32
    return %c0_i32, %c0_i32_0 : i32, i32
  }
  func.func @transform_5(%arg0: i32) -> (i32, i32) {
    %c0_i32 = arith.constant 0 : i32
    %c0_i32_0 = arith.constant 0 : i32
    return %arg0, %c0_i32 : i32, i32
  }
}

</mosaic_0001>

<bundles_post_ra>
// kernel: _lambda_.1
= control target key start
LH: loop header
LB: loop body
LE: loop exit
PB: predicated region body
PF: predicated region fallthrough
CT: control target
= control target key end

     0   :  { %vm329_vm0 = vcmask 261120   ;;  %s820_s1 = inlined_call_operand.vmem [shape: f32[1024,32], index: 1, kind: input, shape index: {}]   ;;  %s821_s2 = inlined_call_operand.vmem [shape: f32[1,32], index: 2, kind: input, shape index: {}]   ;;  %s822_s0 = inlined_call_operand.vmem [shape: f32[8,1024], index: 0, kind: input, shape index: {}]   ;;  %s823_s4 = inlined_call_operand.vmem [shape: f32[1,128], index: 4, kind: input, shape index: {}]   ;;  %s824_s3 = inlined_call_operand.vmem [shape: f32[32,128], index: 3, kind: input, shape index: {}]   ;;  %s825_s5 = inlined_call_operand.vmem [shape: f32[8,128], index: 5, kind: output, shape index: {}]  }
   0x1   :  { %v75_v0 = vld [vmem:[%s820_s1 + $0x178] sm:$0xff]  ;;  %v74_v2 = vld [vmem:[%s820_s1 + $0x170] sm:$0xff]  ;;  %v73_v6 = vld [vmem:[%s820_s1 + $0x168] sm:$0xff] }
   0x2   :  { %v43_v1 = vld [vmem:[%s820_s1 + $0x78] sm:$0xff]  ;;  %200 = vmatpush.msra.mxu2 %v75_v0  ;;  %v42_v4 = vld [vmem:[%s820_s1 + $0x70] sm:$0xff]  ;;  %v41_v8 = vld [vmem:[%s820_s1 + $0x68] sm:$0xff] }
   0x3   :  { %160 = vmatpush.msra.mxu0 %v43_v1  ;;  %v91_v3 = vld [vmem:[%s820_s1 + $0x1f8] sm:$0xff]  ;;  %v90_v7 = vld [vmem:[%s820_s1 + $0x1f0] sm:$0xff]  ;;  %v89_v10 = vld [vmem:[%s820_s1 + $0x1e8] sm:$0xff] }
   0x4   :  { %v59_v5 = vld [vmem:[%s820_s1 + $0xf8] sm:$0xff]  ;;  %220 = vmatpush.msra.mxu3 %v91_v3  ;;  %201 = vmatpush.msra.mxu2 %v74_v2  ;;  %v58_v9 = vld [vmem:[%s820_s1 + $0xf0] sm:$0xff]  ;;  %v72_v11 = vld [vmem:[%s820_s1 + $0x160] sm:$0xff] }
   0x5   :  { %180 = vmatpush.msra.mxu1 %v59_v5  ;;  %161 = vmatpush.msra.mxu0 %v42_v4  ;;  %v40_v12 = vld [vmem:[%s820_s1 + $0x60] sm:$0xff]  ;;  %v57_v13 = vld [vmem:[%s820_s1 + $0xe8] sm:$0xff]  ;;  %v71_v16 = vld [vmem:[%s820_s1 + $0x158] sm:$0xff] }
   0x6   :  { %221 = vmatpush.msra.mxu3 %v90_v7  ;;  %202 = vmatpush.msra.mxu2 %v73_v6  ;;  %v88_v14 = vld [vmem:[%s820_s1 + $0x1e0] sm:$0xff]  ;;  %v39_v17 = vld [vmem:[%s820_s1 + $0x58] sm:$0xff]  ;;  %v70_v20 = vld [vmem:[%s820_s1 + $0x150] sm:$0xff] }
   0x7   :  { %181 = vmatpush.msra.mxu1 %v58_v9  ;;  %162 = vmatpush.msra.mxu0 %v41_v8  ;;  %v56_v15 = vld [vmem:[%s820_s1 + $0xe0] sm:$0xff]  ;;  %v87_v18 = vld [vmem:[%s820_s1 + $0x1d8] sm:$0xff]  ;;  %v38_v21 = vld [vmem:[%s820_s1 + $0x50] sm:$0xff] }
   0x8   :  { %222 = vmatpush.msra.mxu3 %v89_v10  ;;  %203 = vmatpush.msra.mxu2 %v72_v11  ;;  %v55_v19 = vld [vmem:[%s820_s1 + $0xd8] sm:$0xff]  ;;  %v86_v22 = vld [vmem:[%s820_s1 + $0x1d0] sm:$0xff]  ;;  %v69_v24 = vld [vmem:[%s820_s1 + $0x148] sm:$0xff] }
   0x9   :  { %182 = vmatpush.msra.mxu1 %v57_v13  ;;  %163 = vmatpush.msra.mxu0 %v40_v12  ;;  %v54_v23 = vld [vmem:[%s820_s1 + $0xd0] sm:$0xff]  ;;  %v37_v25 = vld [vmem:[%s820_s1 + $0x48] sm:$0xff]  ;;  %v68_v28 = vld [vmem:[%s820_s1 + $0x140] sm:$0xff] }
   0xa   :  { %223 = vmatpush.msra.mxu3 %v88_v14  ;;  %204 = vmatpush.msra.mxu2 %v71_v16  ;;  %v85_v26 = vld [vmem:[%s820_s1 + $0x1c8] sm:$0xff]  ;;  %v36_v29 = vld [vmem:[%s820_s1 + $0x40] sm:$0xff]  ;;  %v67_v32 = vld [vmem:[%s820_s1 + $0x138] sm:$0xff] }
   0xb   :  { %183 = vmatpush.msra.mxu1 %v56_v15  ;;  %164 = vmatpush.msra.mxu0 %v39_v17  ;;  %v53_v27 = vld [vmem:[%s820_s1 + $0xc8] sm:$0xff]  ;;  %v84_v30 = vld [vmem:[%s820_s1 + $0x1c0] sm:$0xff]  ;;  %v35_v33 = vld [vmem:[%s820_s1 + $0x38] sm:$0xff] }
   0xc   :  { %224 = vmatpush.msra.mxu3 %v87_v18  ;;  %205 = vmatpush.msra.mxu2 %v70_v20  ;;  %v52_v31 = vld [vmem:[%s820_s1 + $0xc0] sm:$0xff]  ;;  %v83_v34 = vld [vmem:[%s820_s1 + $0x1b8] sm:$0xff]  ;;  %v66_v36 = vld [vmem:[%s820_s1 + $0x130] sm:$0xff] }
   0xd   :  { %184 = vmatpush.msra.mxu1 %v55_v19  ;;  %165 = vmatpush.msra.mxu0 %v38_v21  ;;  %v51_v35 = vld [vmem:[%s820_s1 + $0xb8] sm:$0xff]  ;;  %v34_v37 = vld [vmem:[%s820_s1 + $0x30] sm:$0xff]  ;;  %v65_v40 = vld [vmem:[%s820_s1 + $0x128] sm:$0xff] }
   0xe   :  { %225 = vmatpush.msra.mxu3 %v86_v22  ;;  %206 = vmatpush.msra.mxu2 %v69_v24  ;;  %v82_v38 = vld [vmem:[%s820_s1 + $0x1b0] sm:$0xff]  ;;  %v33_v41 = vld [vmem:[%s820_s1 + $0x28] sm:$0xff]  ;;  %v64_v44 = vld [vmem:[%s820_s1 + $0x120] sm:$0xff] }
   0xf   :  { %185 = vmatpush.msra.mxu1 %v54_v23  ;;  %166 = vmatpush.msra.mxu0 %v37_v25  ;;  %v50_v39 = vld [vmem:[%s820_s1 + $0xb0] sm:$0xff]  ;;  %v81_v42 = vld [vmem:[%s820_s1 + $0x1a8] sm:$0xff]  ;;  %v32_v45 = vld [vmem:[%s820_s1 + $0x20] sm:$0xff] }
  0x10   :  { %226 = vmatpush.msra.mxu3 %v85_v26  ;;  %207 = vmatpush.msra.mxu2 %v68_v28  ;;  %v49_v43 = vld [vmem:[%s820_s1 + $0xa8] sm:$0xff]  ;;  %v80_v46 = vld [vmem:[%s820_s1 + $0x1a0] sm:$0xff]  ;;  %v63_v48 = vld [vmem:[%s820_s1 + $0x118] sm:$0xff] }
  0x11   :  { %186 = vmatpush.msra.mxu1 %v53_v27  ;;  %167 = vmatpush.msra.mxu0 %v36_v29  ;;  %v48_v47 = vld [vmem:[%s820_s1 + $0xa0] sm:$0xff]  ;;  %v31_v49 = vld [vmem:[%s820_s1 + $0x18] sm:$0xff]  ;;  %v62_v52 = vld [vmem:[%s820_s1 + $0x110] sm:$0xff] }
  0x12   :  { %227 = vmatpush.msra.mxu3 %v84_v30  ;;  %208 = vmatpush.msra.mxu2 %v67_v32  ;;  %v79_v50 = vld [vmem:[%s820_s1 + $0x198] sm:$0xff]  ;;  %v30_v53 = vld [vmem:[%s820_s1 + $0x10] sm:$0xff]  ;;  %v61_v56 = vld [vmem:[%s820_s1 + $0x108] sm:$0xff] }
  0x13   :  { %187 = vmatpush.msra.mxu1 %v52_v31  ;;  %168 = vmatpush.msra.mxu0 %v35_v33  ;;  %v47_v51 = vld [vmem:[%s820_s1 + $0x98] sm:$0xff]  ;;  %v78_v54 = vld [vmem:[%s820_s1 + $0x190] sm:$0xff]  ;;  %v29_v57 = vld [vmem:[%s820_s1 + $0x8] sm:$0xff] }
  0x14   :  { %228 = vmatpush.msra.mxu3 %v83_v34  ;;  %209 = vmatpush.msra.mxu2 %v66_v36  ;;  %v46_v55 = vld [vmem:[%s820_s1 + $0x90] sm:$0xff]  ;;  %v77_v58 = vld [vmem:[%s820_s1 + $0x188] sm:$0xff]  ;;  %v60_v60 = vld [vmem:[%s820_s1 + $0x100] sm:$0xff] }
  0x15   :  { %188 = vmatpush.msra.mxu1 %v51_v35  ;;  %169 = vmatpush.msra.mxu0 %v34_v37  ;;  %v45_v59 = vld [vmem:[%s820_s1 + $0x88] sm:$0xff]  ;;  %v28_v61 = vld [vmem:[%s820_s1] sm:$0xff]  ;;  %v139_v62 = vld [vmem:[%s820_s1 + $0x378] sm:$0xff] }
  0x16   :  { %229 = vmatpush.msra.mxu3 %v82_v38  ;;  %210 = vmatpush.msra.mxu2 %v65_v40  ;;  %v76_v63 = vld [vmem:[%s820_s1 + $0x180] sm:$0xff]  ;;  %v107_v0 = vld [vmem:[%s820_s1 + $0x278] sm:$0xff]  ;;  %v138_v2 = vld [vmem:[%s820_s1 + $0x370] sm:$0xff] }
  0x17   :  { %189 = vmatpush.msra.mxu1 %v50_v39  ;;  %170 = vmatpush.msra.mxu0 %v33_v41  ;;  %v155_v1 = vld [vmem:[%s820_s1 + $0x3f8] sm:$0xff]  ;;  %v44_v3 = vld [vmem:[%s820_s1 + $0x80] sm:$0xff]  ;;  %v106_v4 = vld [vmem:[%s820_s1 + $0x270] sm:$0xff] }
  0x18   :  { %230 = vmatpush.msra.mxu3 %v81_v42  ;;  %211 = vmatpush.msra.mxu2 %v64_v44  ;;  %v123_v5 = vld [vmem:[%s820_s1 + $0x2f8] sm:$0xff]  ;;  %v137_v6 = vld [vmem:[%s820_s1 + $0x368] sm:$0xff]  ;;  %v154_v7 = vld [vmem:[%s820_s1 + $0x3f0] sm:$0xff] }
  0x19   :  { %190 = vmatpush.msra.mxu1 %v49_v43  ;;  %171 = vmatpush.msra.mxu0 %v32_v45  ;;  %v105_v8 = vld [vmem:[%s820_s1 + $0x268] sm:$0xff]  ;;  %v122_v9 = vld [vmem:[%s820_s1 + $0x2f0] sm:$0xff]  ;;  %v136_v10 = vld [vmem:[%s820_s1 + $0x360] sm:$0xff] }
  0x1a   :  { %231 = vmatpush.msra.mxu3 %v80_v46  ;;  %212 = vmatpush.msra.mxu2 %v63_v48  ;;  %v153_v11 = vld [vmem:[%s820_s1 + $0x3e8] sm:$0xff]  ;;  %v104_v12 = vld [vmem:[%s820_s1 + $0x260] sm:$0xff]  ;;  %v135_v14 = vld [vmem:[%s820_s1 + $0x358] sm:$0xff] }
  0x1b   :  { %191 = vmatpush.msra.mxu1 %v48_v47  ;;  %172 = vmatpush.msra.mxu0 %v31_v49  ;;  %v121_v13 = vld [vmem:[%s820_s1 + $0x2e8] sm:$0xff]  ;;  %v152_v15 = vld [vmem:[%s820_s1 + $0x3e0] sm:$0xff]  ;;  %v103_v16 = vld [vmem:[%s820_s1 + $0x258] sm:$0xff] }
  0x1c   :  { %232 = vmatpush.msra.mxu3 %v79_v50  ;;  %213 = vmatpush.msra.mxu2 %v62_v52  ;;  %v120_v17 = vld [vmem:[%s820_s1 + $0x2e0] sm:$0xff]  ;;  %v134_v18 = vld [vmem:[%s820_s1 + $0x350] sm:$0xff]  ;;  %v151_v19 = vld [vmem:[%s820_s1 + $0x3d8] sm:$0xff] }
  0x1d   :  { %192 = vmatpush.msra.mxu1 %v47_v51  ;;  %173 = vmatpush.msra.mxu0 %v30_v53  ;;  %v102_v20 = vld [vmem:[%s820_s1 + $0x250] sm:$0xff]  ;;  %v119_v21 = vld [vmem:[%s820_s1 + $0x2d8] sm:$0xff]  ;;  %v133_v22 = vld [vmem:[%s820_s1 + $0x348] sm:$0xff] }
  0x1e   :  { %233 = vmatpush.msra.mxu3 %v78_v54  ;;  %214 = vmatpush.msra.mxu2 %v61_v56  ;;  %v150_v23 = vld [vmem:[%s820_s1 + $0x3d0] sm:$0xff]  ;;  %v101_v24 = vld [vmem:[%s820_s1 + $0x248] sm:$0xff]  ;;  %v132_v26 = vld [vmem:[%s820_s1 + $0x340] sm:$0xff] }
  0x1f   :  { %193 = vmatpush.msra.mxu1 %v46_v55  ;;  %174 = vmatpush.msra.mxu0 %v29_v57  ;;  %v118_v25 = vld [vmem:[%s820_s1 + $0x2d0] sm:$0xff]  ;;  %v149_v27 = vld [vmem:[%s820_s1 + $0x3c8] sm:$0xff]  ;;  %v100_v28 = vld [vmem:[%s820_s1 + $0x240] sm:$0xff] }
  0x20   :  { %234 = vmatpush.msra.mxu3 %v77_v58  ;;  %215 = vmatpush.msra.mxu2 %v60_v60  ;;  %v117_v29 = vld [vmem:[%s820_s1 + $0x2c8] sm:$0xff]  ;;  %v131_v30 = vld [vmem:[%s820_s1 + $0x338] sm:$0xff]  ;;  %v148_v31 = vld [vmem:[%s820_s1 + $0x3c0] sm:$0xff] }
  0x21   :  { %194 = vmatpush.msra.mxu1 %v45_v59  ;;  %175 = vmatpush.msra.mxu0 %v28_v61  ;;  %v99_v32 = vld [vmem:[%s820_s1 + $0x238] sm:$0xff]  ;;  %v116_v33 = vld [vmem:[%s820_s1 + $0x2c0] sm:$0xff]  ;;  %v130_v34 = vld [vmem:[%s820_s1 + $0x330] sm:$0xff] }
  0x22   :  { %280 = vmatpush.msrb.mxu2 %v139_v62  ;;  %235 = vmatpush.msra.mxu3 %v76_v63  ;;  %v147_v35 = vld [vmem:[%s820_s1 + $0x3b8] sm:$0xff]  ;;  %v98_v36 = vld [vmem:[%s820_s1 + $0x230] sm:$0xff]  ;;  %v129_v38 = vld [vmem:[%s820_s1 + $0x328] sm:$0xff] }
  0x23   :  { %240 = vmatpush.msrb.mxu0 %v107_v0  ;;  %195 = vmatpush.msra.mxu1 %v44_v3  ;;  %v115_v37 = vld [vmem:[%s820_s1 + $0x2b8] sm:$0xff]  ;;  %v146_v39 = vld [vmem:[%s820_s1 + $0x3b0] sm:$0xff]  ;;  %v97_v40 = vld [vmem:[%s820_s1 + $0x228] sm:$0xff] }
  0x24   :  { %300 = vmatpush.msrb.mxu3 %v155_v1  ;;  %281 = vmatpush.msrb.mxu2 %v138_v2  ;;  %v114_v41 = vld [vmem:[%s820_s1 + $0x2b0] sm:$0xff]  ;;  %v128_v42 = vld [vmem:[%s820_s1 + $0x320] sm:$0xff]  ;;  %v145_v43 = vld [vmem:[%s820_s1 + $0x3a8] sm:$0xff] }
  0x25   :  { %241 = vmatpush.msrb.mxu0 %v106_v4  ;;  %260 = vmatpush.msrb.mxu1 %v123_v5  ;;  %v22_v44 = vld [vmem:[%s822_s0 + $0x10] sm:$0xff]  ;;  %v96_v45 = vld [vmem:[%s820_s1 + $0x220] sm:$0xff]  ;;  %v113_v46 = vld [vmem:[%s820_s1 + $0x2a8] sm:$0xff] }
  0x26   :  { %282 = vmatpush.msrb.mxu2 %v137_v6  ;;  %301 = vmatpush.msrb.mxu3 %v154_v7  ;;  %v127_v47 = vld [vmem:[%s820_s1 + $0x318] sm:$0xff]  ;;  %v144_v48 = vld [vmem:[%s820_s1 + $0x3a0] sm:$0xff]  ;;  %v126_v53 = vld [vmem:[%s820_s1 + $0x310] sm:$0xff] }
  0x27   :  { %242 = vmatpush.msrb.mxu0 %v105_v8  ;;  %261 = vmatpush.msrb.mxu1 %v122_v9  ;;  %v20_v49 = vld [vmem:[%s822_s0] sm:$0xff]  ;;  %v23_v50 = vld [vmem:[%s822_s0 + $0x18] sm:$0xff]  ;;  %v21_v55 = vld [vmem:[%s822_s0 + $0x8] sm:$0xff] }
  0x28   :  { %283 = vmatpush.msrb.mxu2 %v136_v10  ;;  %302 = vmatpush.msrb.mxu3 %v153_v11  ;;  %v95_v51 = vld [vmem:[%s820_s1 + $0x218] sm:$0xff]  ;;  %v112_v52 = vld [vmem:[%s820_s1 + $0x2a0] sm:$0xff]  ;;  %v94_v56 = vld [vmem:[%s820_s1 + $0x210] sm:$0xff] }
  0x29   :  { %243 = vmatpush.msrb.mxu0 %v104_v12  ;;  %262 = vmatpush.msrb.mxu1 %v121_v13  ;;  %v143_v54 = vld [vmem:[%s820_s1 + $0x398] sm:$0xff]  ;;  %v125_v58 = vld [vmem:[%s820_s1 + $0x308] sm:$0xff]  ;;  %v142_v59 = vld [vmem:[%s820_s1 + $0x390] sm:$0xff] }
  0x2a   :  { %284 = vmatpush.msrb.mxu2 %v135_v14  ;;  %303 = vmatpush.msrb.mxu3 %v152_v15  ;;  %v111_v57 = vld [vmem:[%s820_s1 + $0x298] sm:$0xff]  ;;  %v93_v60 = vld [vmem:[%s820_s1 + $0x208] sm:$0xff]  ;;  %v110_v61 = vld [vmem:[%s820_s1 + $0x290] sm:$0xff] }
  0x2b   :  { %244 = vmatpush.msrb.mxu0 %v103_v16  ;;  %263 = vmatpush.msrb.mxu1 %v120_v17  ;;  %v124_v62 = vld [vmem:[%s820_s1 + $0x300] sm:$0xff]  ;;  %v141_v63 = vld [vmem:[%s820_s1 + $0x388] sm:$0xff]  ;;  %v26_v0 = vld [vmem:[%s822_s0 + $0x30] sm:$0xff] }
  0x2c   :  { %285 = vmatpush.msrb.mxu2 %v134_v18  ;;  %304 = vmatpush.msrb.mxu3 %v151_v19  ;;  %v92_v1 = vld [vmem:[%s820_s1 + $0x200] sm:$0xff]  ;;  %v109_v2 = vld [vmem:[%s820_s1 + $0x288] sm:$0xff]  ;;  %v27_v5 = vld [vmem:[%s822_s0 + $0x38] sm:$0xff] }
  0x2d   :  { %245 = vmatpush.msrb.mxu0 %v102_v20  ;;  %264 = vmatpush.msrb.mxu1 %v119_v21  ;;  %v140_v3 = vld [vmem:[%s820_s1 + $0x380] sm:$0xff]  ;;  %v25_v7 = vld [vmem:[%s822_s0 + $0x28] sm:$0xff]  ;;  %v324_v8 = vld [vmem:[%s824_s3 + $0x18] sm:$0xff] }
  0x2e   :  { %286 = vmatpush.msrb.mxu2 %v133_v22  ;;  %305 = vmatpush.msrb.mxu3 %v150_v23  ;;  %v24_v4 = vld [vmem:[%s822_s0 + $0x20] sm:$0xff]  ;;  %v323_v9 = vld [vmem:[%s824_s3 + $0x10] sm:$0xff]  ;;  %v322_v10 = vld [vmem:[%s824_s3 + $0x8] sm:$0xff] }
  0x2f   :  { %246 = vmatpush.msrb.mxu0 %v101_v24  ;;  %265 = vmatpush.msrb.mxu1 %v118_v25  ;;  %v108_v6 = vld [vmem:[%s820_s1 + $0x280] sm:$0xff] }
  0x30   :  { %287 = vmatpush.msrb.mxu2 %v132_v26  ;;  %306 = vmatpush.msrb.mxu3 %v149_v27  ;;  %v321_v11 = vld [vmem:[%s824_s3] sm:$0xff] }
  0x31   :  { %247 = vmatpush.msrb.mxu0 %v100_v28  ;;  %266 = vmatpush.msrb.mxu1 %v117_v29  ;;  %v359_v12 = vld [vmem:[%s821_s2] ss:$0 sm:$0xff] }
  0x32   :  { %288 = vmatpush.msrb.mxu2 %v131_v30  ;;  %307 = vmatpush.msrb.mxu3 %v148_v31  ;;  %v360_v30 = vld [vmem:[%s823_s4] ss:$0 sm:$0xff] }
  0x33   :  { %248 = vmatpush.msrb.mxu0 %v99_v32  ;;  %267 = vmatpush.msrb.mxu1 %v116_v33 }
  0x34   :  { %289 = vmatpush.msrb.mxu2 %v130_v34  ;;  %308 = vmatpush.msrb.mxu3 %v147_v35 }
  0x35   :  { %249 = vmatpush.msrb.mxu0 %v98_v36  ;;  %268 = vmatpush.msrb.mxu1 %v115_v37 }
  0x36   :  { %290 = vmatpush.msrb.mxu2 %v129_v38  ;;  %309 = vmatpush.msrb.mxu3 %v146_v39 }
  0x37   :  { %250 = vmatpush.msrb.mxu0 %v97_v40  ;;  %269 = vmatpush.msrb.mxu1 %v114_v41 }
  0x38   :  { %291 = vmatpush.msrb.mxu2 %v128_v42  ;;  %310 = vmatpush.msrb.mxu3 %v145_v43 }
  0x39   :  { %216 = vmatmul.f32.vlgmr.msra.gmra.mxu2 %v22_v44  ;;  %251 = vmatpush.msrb.mxu0 %v96_v45 }
  0x3a   :  { %270 = vmatpush.msrb.mxu1 %v113_v46  ;;  %292 = vmatpush.msrb.mxu2 %v127_v47 }
  0x3b   :  { %311 = vmatpush.msrb.mxu3 %v144_v48  ;;  %176 = vmatmul.f32.vlgmr.msra.gmra.mxu0 %v20_v49 }
  0x3c   :  { %236 = vmatmul.f32.vlgmr.msra.gmra.mxu3 %v23_v50  ;;  %252 = vmatpush.msrb.mxu0 %v95_v51 }
  0x3d   :  { %271 = vmatpush.msrb.mxu1 %v112_v52  ;;  %293 = vmatpush.msrb.mxu2 %v126_v53 }
  0x3e   :  { %312 = vmatpush.msrb.mxu3 %v143_v54  ;;  %196 = vmatmul.f32.vlgmr.msra.gmra.mxu1 %v21_v55 }
  0x3f   :  { %253 = vmatpush.msrb.mxu0 %v94_v56  ;;  %272 = vmatpush.msrb.mxu1 %v111_v57 }
  0x40   :  { %294 = vmatpush.msrb.mxu2 %v125_v58  ;;  %313 = vmatpush.msrb.mxu3 %v142_v59 }
  0x41   :  { %254 = vmatpush.msrb.mxu0 %v93_v60  ;;  %273 = vmatpush.msrb.mxu1 %v110_v61 }
  0x42   :  { %295 = vmatpush.msrb.mxu2 %v124_v62  ;;  %314 = vmatpush.msrb.mxu3 %v141_v63 }
  0x43   :  { %296 = vmatmul.f32.vlgmr.msrb.gmra.mxu2 %v26_v0  ;;  %255 = vmatpush.msrb.mxu0 %v92_v1 }
  0x44   :  { %274 = vmatpush.msrb.mxu1 %v109_v2  ;;  %315 = vmatpush.msrb.mxu3 %v140_v3 }
  0x45   :  { %256 = vmatmul.f32.vlgmr.msrb.gmra.mxu0 %v24_v4  ;;  %316 = vmatmul.f32.vlgmr.msrb.gmra.mxu3 %v27_v5 }
  0x46   :  { %275 = vmatpush.msrb.mxu1 %v108_v6  ;;  %345 = vmatpush.msra.mxu0 %v324_v8 }
  0x47   :  { %276 = vmatmul.f32.vlgmr.msrb.gmra.mxu1 %v25_v7 }
  0x48   :  { %346 = vmatpush.msra.mxu0 %v323_v9 }
  0x4a   :  { %347 = vmatpush.msra.mxu0 %v322_v10 }
  0x4c   :  { %348 = vmatpush.msra.mxu0 %v321_v11 }
  0xb8   :  { %v177_v13 = vpop.f32.mrf.mxu0 }
  0xb9   :  { %v178_v14 = vadd.f32 %v359_v12, %v177_v13 }
  0xbb   :  { %v197_v15 = vpop.f32.mrf.mxu1 }
  0xbc   :  { %v198_v16 = vadd.f32 %v197_v15, %v178_v14  ;;  %v217_v17 = vpop.f32.mrf.mxu2 }
  0xbe   :  { %v218_v18 = vadd.f32 %v217_v17, %v198_v16 }
  0xbf   :  { %v237_v19 = vpop.f32.mrf.mxu3 }
  0xc0   :  { %v238_v20 = vadd.f32 %v237_v19, %v218_v18 }
  0xc2   :  { %v257_v21 = vpop.f32.mrf.mxu0 }
  0xc3   :  { %v258_v22 = vadd.f32 %v257_v21, %v238_v20 }
  0xc4   :  { %v277_v23 = vpop.f32.mrf.mxu1 }
  0xc5   :  { %v278_v24 = vadd.f32 %v277_v23, %v258_v22 }
  0xc6   :  { %v297_v25 = vpop.f32.mrf.mxu2 }
  0xc7   :  { %v298_v26 = vadd.f32 %v297_v25, %v278_v24 }
  0xc8   :  { %v317_v27 = vpop.f32.mrf.mxu3 }
  0xc9   :  { %v318_v28 = vadd.f32 %v317_v27, %v298_v26 }
  0xcb   :  { %v320_v29 = vmax.f32 %v318_v28, 0.0 }
  0xcd   :  { %358 = vmatmul.msk.f32.vlgmr.msra.gmra.mxu0 %vm329_vm0, %v320_v29 }
 0x14a   :  { %v350_v31 = vpop.f32.mrf.mxu0 }
 0x14b   :  { %v351_v32 = vadd.f32 %v360_v30, %v350_v31 }
 0x14d   :  { %353 = vst [vmem:[%s825_s5] sm:$0xff] %v351_v32 }

</bundles_post_ra>
